<compile_context>
chip_gen: v7x
topology: tpu7x:2x2x1
jax: 0.10.0
libtpu: 0.0.40
codegen_flags: <defaults>
</compile_context>

<pallas_src>
import jax
import jax.numpy as jnp
import numpy as np
from jax import lax
from jax.experimental import pallas as pl
from jax.experimental.pallas import tpu as pltpu


# --------------------------- kernel --------------------------------------- #
def _make_kernel(H, W, cin, cout, nb):
    Hp2 = H + 2
    R = nb * Hp2          # padded rows in this block (nb stacked samples)
    M = R - 2             # matmul M-dim (conv output rows incl. garbage rows)
    KC = (W + 2) * cin    # lane width of padded activations
    WCout = W * cout

    def kernel(x_ref, band1_ref, b1_ref, band2_ref, bandsc_ref, b2_ref,
               y_ref, h1pad_ref):
        f32 = jnp.float32

        # ---- conv1 (3x3, BN1 scale folded) : 3 accumulating band matmuls ----
        acc1 = jnp.dot(x_ref[0:M, :], band1_ref[0], preferred_element_type=f32)
        acc1 = acc1 + jnp.dot(x_ref[1:M + 1, :], band1_ref[1],
                              preferred_element_type=f32)
        acc1 = acc1 + jnp.dot(x_ref[2:M + 2, :], band1_ref[2],
                              preferred_element_type=f32)
        # band1/b1 keep the halo *columns* exactly zero; relu keeps them zero.
        h1 = jnp.maximum(acc1 + b1_ref[...], 0.0)
        # Rows straddling sample boundaries become the inter-sample halo rows
        # of h1pad -> force them to zero.  (Done every grid step: safe under
        # "parallel" semantics, each core owns its scratch.)
        row = lax.broadcasted_iota(jnp.int32, h1.shape, 0)
        h1 = jnp.where(row % Hp2 < H, h1, 0.0)

        # Stage padded h1 (bf16) for conv2.  Only the outermost two halo rows
        # still need explicit zeroing.
        h1pad_ref[0:1, :] = jnp.zeros((1, KC), h1pad_ref.dtype)
        h1pad_ref[R - 1:R, :] = jnp.zeros((1, KC), h1pad_ref.dtype)
        h1pad_ref[1:M + 1, :] = h1.astype(h1pad_ref.dtype)

        # ---- conv2 (3x3, BN2 scale folded) + folded 1x1 shortcut band --------
        acc2 = jnp.dot(h1pad_ref[0:M, :], band2_ref[0],
                       preferred_element_type=f32)
        acc2 = acc2 + jnp.dot(h1pad_ref[1:M + 1, :], band2_ref[1],
                              preferred_element_type=f32)
        acc2 = acc2 + jnp.dot(h1pad_ref[2:M + 2, :], band2_ref[2],
                              preferred_element_type=f32)
        # shortcut: projection band (Cin != Cout) or identity band (Cin == Cout)
        acc2 = acc2 + jnp.dot(x_ref[1:M + 1, :], bandsc_ref[...],
                              preferred_element_type=f32)
        y = jnp.maximum(acc2 + b2_ref[...], 0.0)

        # Output uses the same padded-row layout; halo rows are sliced away by
        # the wrapper, we just zero the two uncovered ones for determinism.
        y_ref[0:1, :] = jnp.zeros((1, WCout), y_ref.dtype)
        y_ref[R - 1:R, :] = jnp.zeros((1, WCout), y_ref.dtype)
        y_ref[1:M + 1, :] = y.astype(y_ref.dtype)

    return kernel


def _pick_nb(n, hp2):
    """Samples per grid step. When tiling (nb < n) keep the row block a
    multiple of 16 so bf16 (16,128) / f32 (8,128) sublane tiling is respected;
    nb == n (block == full array) is always legal."""
    for nb in (16, 8, 4, 2):
        if nb < n and n % nb == 0 and (nb * hp2) % 16 == 0:
            return nb
    return n


@jax.jit
def block_pallas(x_nchw, kp):
    """NCHW f32 in / NCHW f32 out (matches the PyTorch module interface)."""
    N, Cin, H, W = x_nchw.shape
    Cout = kp['b2'].shape[1] // W
    Hp2 = H + 2

    # NCHW -> NHWC -> zero-pad spatially -> stacked padded rows (lane-dense).
    # The pad fuses with the transpose/cast XLA already has to do.
    x = jnp.transpose(x_nchw, (0, 2, 3, 1))
    xp = jnp.pad(x, ((0, 0), (1, 1), (1, 1), (0, 0)))
    x2d = xp.astype(jnp.bfloat16).reshape(N * Hp2, (W + 2) * Cin)

    nb = _pick_nb(N, Hp2)
    grid = (N // nb,)

    y2d = pl.pallas_call(
        _make_kernel(H, W, Cin, Cout, nb),
        out_shape=jax.ShapeDtypeStruct((N * Hp2, W * Cout), jnp.float32),
        grid=grid,
        in_specs=[
            pl.BlockSpec((nb * Hp2, (W + 2) * Cin), lambda g: (g, 0)),
            pl.BlockSpec(kp['band1'].shape, lambda g: (0, 0, 0)),
            pl.BlockSpec(kp['b1'].shape, lambda g: (0, 0)),
            pl.BlockSpec(kp['band2'].shape, lambda g: (0, 0, 0)),
            pl.BlockSpec(kp['bandsc'].shape, lambda g: (0, 0)),
            pl.BlockSpec(kp['b2'].shape, lambda g: (0, 0)),
        ],
        out_specs=pl.BlockSpec((nb * Hp2, W * Cout), lambda g: (g, 0)),
        scratch_shapes=[
            pltpu.VMEM((nb * Hp2, (W + 2) * Cin), jnp.bfloat16),   # padded h1
        ],
        compiler_params=pltpu.CompilerParams(
            dimension_semantics=("parallel",),
            vmem_limit_bytes=32 * 1024 * 1024),
    )(x2d, kp['band1'], kp['b1'], kp['band2'], kp['bandsc'], kp['b2'])

    y = y2d.reshape(N, Hp2, W, Cout)[:, 1:H + 1]        # drop halo rows
    return jnp.transpose(y, (0, 3, 1, 2))               # NHWC -> NCHW


# -------------------- band-matrix construction (host) ---------------------- #
def _conv_band(w_oihw, W, pad_output):
    """3x3 conv as 3 block-Toeplitz bands: out[r] = sum_dy rows[r+dy] @ band[dy].
    If pad_output, output columns use the padded (W+2)*Co layout with zero halo
    columns, so the result can be written straight into a padded buffer."""
    Co, Ci, KH, KW = w_oihw.shape
    assert KH == 3 and KW == 3
    Wout = W + 2 if pad_output else W
    off = 1 if pad_output else 0
    bands = np.zeros((3, (W + 2) * Ci, Wout * Co), np.float32)
    for dy in range(3):
        for dx in range(3):
            blk = np.asarray(w_oihw[:, :, dy, dx]).T          # (Ci, Co)
            for x in range(W):
                r0 = (x + dx) * Ci
                c0 = (x + off) * Co
                bands[dy, r0:r0 + Ci, c0:c0 + Co] = blk
    return bands


def _proj_band(w_oi, W):
    """1x1 conv as a block-diagonal band over the padded-column layout."""
    Co, Ci = w_oi.shape
    band = np.zeros(((W + 2) * Ci, W * Co), np.float32)
    blk = np.asarray(w_oi).T
    for x in range(W):
        band[(x + 1) * Ci:(x + 2) * Ci, x * Co:(x + 1) * Co] = blk
    return band


# ------------------------ parameter construction --------------------------- #
def init_params(key, cin, cout):
    ks = jax.random.split(key, 14)

    def conv_w(k, ci, co, kh, kw):
        bound = 1.0 / np.sqrt(ci * kh * kw)
        return jax.random.uniform(k, (co, ci, kh, kw), jnp.float32, -bound, bound)

    def conv_b(k, ci, co, kh, kw):
        bound = 1.0 / np.sqrt(ci * kh * kw)
        return jax.random.uniform(k, (co,), jnp.float32, -bound, bound)

    p = {}
    p['w1_t'] = conv_w(ks[0], cin, cin, 3, 3)
    p['b1c'] = conv_b(ks[1], cin, cin, 3, 3)
    p['w2_t'] = conv_w(ks[2], cin, cout, 3, 3)
    p['b2c'] = conv_b(ks[3], cin, cout, 3, 3)
    # deterministic (non-default) BN params, inference mode
    p['g1'] = 1.0 + 0.1 * jax.random.normal(ks[4], (cin,), jnp.float32)
    p['be1'] = 0.1 * jax.random.normal(ks[5], (cin,), jnp.float32)
    p['m1'] = 0.1 * jax.random.normal(ks[6], (cin,), jnp.float32)
    p['v1'] = 1.0 + 0.1 * jax.random.uniform(ks[7], (cin,), jnp.float32)
    p['g2'] = 1.0 + 0.1 * jax.random.normal(ks[8], (cout,), jnp.float32)
    p['be2'] = 0.1 * jax.random.normal(ks[9], (cout,), jnp.float32)
    p['m2'] = 0.1 * jax.random.normal(ks[10], (cout,), jnp.float32)
    p['v2'] = 1.0 + 0.1 * jax.random.uniform(ks[11], (cout,), jnp.float32)
    if cin != cout:
        p['wsc_t'] = conv_w(ks[12], cin, cout, 1, 1)
        p['bsc'] = conv_b(ks[13], cin, cout, 1, 1)
    return p


def prepare_kernel_params(p, cin, cout, W, eps=1e-5):
    """Fold BN (inference) into the conv weights/biases and build the band
    matrices the kernel consumes, plus matching reference params."""
    P = {k: np.asarray(v) for k, v in p.items()}
    s1 = P['g1'] / np.sqrt(P['v1'] + eps)
    b1 = s1 * (P['b1c'] - P['m1']) + P['be1']
    s2 = P['g2'] / np.sqrt(P['v2'] + eps)
    b2 = s2 * (P['b2c'] - P['m2']) + P['be2']

    def to_bf16(a):  # round to bf16-representable values (kernel uses bf16 weights)
        return np.asarray(jnp.asarray(a, jnp.float32)
                          .astype(jnp.bfloat16).astype(jnp.float32))

    w1s = to_bf16(P['w1_t'] * s1[:, None, None, None])    # BN1 scale folded
    w2s = to_bf16(P['w2_t'] * s2[:, None, None, None])    # BN2 scale folded
    if 'wsc_t' in P:
        wsc = to_bf16(P['wsc_t'][:, :, 0, 0])              # (cout, cin)
        b2 = b2 + P['bsc']                                  # shortcut bias folded
    else:
        wsc = np.eye(cout, cin, dtype=np.float32)           # identity shortcut band

    band1 = _conv_band(w1s, W, pad_output=True)             # (3,(W+2)cin,(W+2)cin)
    band2 = _conv_band(w2s, W, pad_output=False)            # (3,(W+2)cin, W*cout)
    bandsc = _proj_band(wsc, W)                              # ((W+2)cin, W*cout)

    b1_full = np.zeros((1, (W + 2) * cin), np.float32)      # zero in halo columns
    b1_full[0, cin:(W + 1) * cin] = np.tile(b1.astype(np.float32), W)
    b2_full = np.tile(b2.astype(np.float32), W)[None, :]

    kp = dict(band1=jnp.asarray(band1, jnp.bfloat16),
              band2=jnp.asarray(band2, jnp.bfloat16),
              bandsc=jnp.asarray(bandsc, jnp.bfloat16),
              b1=jnp.asarray(b1_full),
              b2=jnp.asarray(b2_full))
    rp = dict(w1=jnp.asarray(np.transpose(w1s, (2, 3, 1, 0))),   # HWIO
              w2=jnp.asarray(np.transpose(w2s, (2, 3, 1, 0))),
              wsc=jnp.asarray(wsc.T),                            # (cin, cout)
              b1=jnp.asarray(b1.astype(np.float32)),
              b2=jnp.asarray(b2.astype(np.float32)))
    return kp, rp


# ------------------------ references (for validation) ---------------------- #
def block_reference_mixed(x_nchw, rp):
    """Matches the kernel's folded weights and mixed precision."""
    q = lambda a: a.astype(jnp.bfloat16).astype(jnp.float32)
    x = q(jnp.transpose(x_nchw, (0, 2, 3, 1)))

    def conv3(v, w):
        return lax.conv_general_dilated(v, w, (1, 1), [(1, 1), (1, 1)],
                                        dimension_numbers=('NHWC', 'HWIO', 'NHWC'))

    h1 = q(jnp.maximum(conv3(x, rp['w1']) + rp['b1'], 0.0))
    h2 = conv3(h1, rp['w2']) + rp['b2']
    sc = jnp.einsum('nhwc,cd->nhwd', x, rp['wsc'])
    y = jnp.maximum(h2 + sc, 0.0)
    return jnp.transpose(y, (0, 3, 1, 2))


def block_reference(x_nchw, p, cin, cout, eps=1e-5):
    """Full-f32 equivalent of the PyTorch module (inference-mode BN)."""
    x = jnp.transpose(x_nchw, (0, 2, 3, 1)).astype(jnp.float32)

    def conv(v, w_torch, b, pad):
        w = jnp.transpose(w_torch, (2, 3, 1, 0))  # OIHW -> HWIO
        y = lax.conv_general_dilated(v, w, (1, 1), [(pad, pad), (pad, pad)],
                                     dimension_numbers=('NHWC', 'HWIO', 'NHWC'))
        return y + b

    def bn(v, g, be, m, var):
        return (v - m) / jnp.sqrt(var + eps) * g + be

    h = conv(x, p['w1_t'], p['b1c'], 1)
    h = jax.nn.relu(bn(h, p['g1'], p['be1'], p['m1'], p['v1']))
    h = conv(h, p['w2_t'], p['b2c'], 1)
    h = bn(h, p['g2'], p['be2'], p['m2'], p['v2'])
    sc = conv(x, p['wsc_t'], p['bsc'], 0) if cin != cout else x
    y = jax.nn.relu(h + sc)
    return jnp.transpose(y, (0, 3, 1, 2))


if __name__ == "__main__":
    key = jax.random.PRNGKey(0)
    N, H, W = 2, 16, 16

    for (cin, cout) in [(4, 8), (4, 4)]:   # projection shortcut + identity shortcut
        kx, kparam = jax.random.split(jax.random.fold_in(key, cout))
        x = jax.random.normal(kx, (N, cin, H, W), jnp.float32)   # NCHW like PyTorch
        p = init_params(kparam, cin, cout)
        kp, rp = prepare_kernel_params(p, cin, cout, W)

        y = jax.block_until_ready(block_pallas(x, kp))

        # Tight check against a reference with matching folding / precision.
        y_mixed = jax.block_until_ready(block_reference_mixed(x, rp))
        np.testing.assert_allclose(np.asarray(y), np.asarray(y_mixed),
                                   rtol=1e-2, atol=1e-2)
        # Loose sanity check against the full-f32 PyTorch-equivalent reference.
        y_f32 = jax.block_until_ready(block_reference(x, p, cin, cout))
        np.testing.assert_allclose(np.asarray(y), np.asarray(y_f32),
                                   rtol=1e-1, atol=1e-1)

    print("KERNEL_OK")
</pallas_src>

<mosaic_0001>
module attributes {stable_mosaic.version = 11 : i64} {
  func.func @kernel(%arg0: i32, %arg1: memref<36x72xbf16, #tpu.memory_space<vmem>>, %arg2: memref<3x72x72xbf16, #tpu.memory_space<vmem>>, %arg3: memref<1x72xf32, #tpu.memory_space<vmem>>, %arg4: memref<3x72x128xbf16, #tpu.memory_space<vmem>>, %arg5: memref<72x128xbf16, #tpu.memory_space<vmem>>, %arg6: memref<1x128xf32, #tpu.memory_space<vmem>>, %arg7: memref<36x128xf32, #tpu.memory_space<vmem>>, %arg8: memref<36x72xbf16, #tpu.memory_space<vmem>>) attributes {dimension_semantics = [#tpu.dimension_semantics<parallel>], iteration_bounds = array<i64: 1>, scalar_prefetch = 0 : i64, scratch_operands = 1 : i64, tpu.core_type = #tpu.core_type<tc>, window_params = [{transform_indices = @transform_0, window_bounds = array<i64: 36, 72>}, {pipeline_mode = #tpu.pipeline_mode<synchronous>, transform_indices = @transform_1, window_bounds = array<i64: 3, 72, 72>}, {pipeline_mode = #tpu.pipeline_mode<synchronous>, transform_indices = @transform_2, window_bounds = array<i64: 1, 72>}, {pipeline_mode = #tpu.pipeline_mode<synchronous>, transform_indices = @transform_3, window_bounds = array<i64: 3, 72, 128>}, {pipeline_mode = #tpu.pipeline_mode<synchronous>, transform_indices = @transform_4, window_bounds = array<i64: 72, 128>}, {pipeline_mode = #tpu.pipeline_mode<synchronous>, transform_indices = @transform_5, window_bounds = array<i64: 1, 128>}, {transform_indices = @transform_6, window_bounds = array<i64: 36, 128>}]} {
    %c0 = arith.constant 0 : index
    %c0_0 = arith.constant 0 : index
    %0 = vector.load %arg1[%c0, %c0_0] : memref<36x72xbf16, #tpu.memory_space<vmem>>, vector<34x72xbf16>
    %c0_1 = arith.constant 0 : index
    %c0_2 = arith.constant 0 : index
    %c0_3 = arith.constant 0 : index
    %1 = vector.load %arg2[%c0_1, %c0_2, %c0_3] : memref<3x72x72xbf16, #tpu.memory_space<vmem>>, vector<1x72x72xbf16>
    %2 = vector.shape_cast %1 : vector<1x72x72xbf16> to vector<72x72xbf16>
    %cst = arith.constant dense<0.000000e+00> : vector<34x72xf32>
    %3 = tpu.matmul %0, %2, %cst {dimension_numbers = #tpu.dot_dimension_numbers<[1], [0], [0], [1], [0, 0, 1, 1], [], []>} : vector<34x72xbf16>, vector<72x72xbf16>, vector<34x72xf32> -> vector<34x72xf32>
    %c1 = arith.constant 1 : index
    %c0_4 = arith.constant 0 : index
    %4 = vector.load %arg1[%c1, %c0_4] : memref<36x72xbf16, #tpu.memory_space<vmem>>, vector<34x72xbf16>
    %c1_5 = arith.constant 1 : index
    %c0_6 = arith.constant 0 : index
    %c0_7 = arith.constant 0 : index
    %5 = vector.load %arg2[%c1_5, %c0_6, %c0_7] : memref<3x72x72xbf16, #tpu.memory_space<vmem>>, vector<1x72x72xbf16>
    %6 = vector.shape_cast %5 : vector<1x72x72xbf16> to vector<72x72xbf16>
    %cst_8 = arith.constant dense<0.000000e+00> : vector<34x72xf32>
    %7 = tpu.matmul %4, %6, %cst_8 {dimension_numbers = #tpu.dot_dimension_numbers<[1], [0], [0], [1], [0, 0, 1, 1], [], []>} : vector<34x72xbf16>, vector<72x72xbf16>, vector<34x72xf32> -> vector<34x72xf32>
    %8 = arith.addf %3, %7 : vector<34x72xf32>
    %c2 = arith.constant 2 : index
    %c0_9 = arith.constant 0 : index
    %9 = vector.load %arg1[%c2, %c0_9] : memref<36x72xbf16, #tpu.memory_space<vmem>>, vector<34x72xbf16>
    %c2_10 = arith.constant 2 : index
    %c0_11 = arith.constant 0 : index
    %c0_12 = arith.constant 0 : index
    %10 = vector.load %arg2[%c2_10, %c0_11, %c0_12] : memref<3x72x72xbf16, #tpu.memory_space<vmem>>, vector<1x72x72xbf16>
    %11 = vector.shape_cast %10 : vector<1x72x72xbf16> to vector<72x72xbf16>
    %cst_13 = arith.constant dense<0.000000e+00> : vector<34x72xf32>
    %12 = tpu.matmul %9, %11, %cst_13 {dimension_numbers = #tpu.dot_dimension_numbers<[1], [0], [0], [1], [0, 0, 1, 1], [], []>} : vector<34x72xbf16>, vector<72x72xbf16>, vector<34x72xf32> -> vector<34x72xf32>
    %13 = arith.addf %8, %12 : vector<34x72xf32>
    %c0_14 = arith.constant 0 : index
    %c0_15 = arith.constant 0 : index
    %14 = vector.load %arg3[%c0_14, %c0_15] : memref<1x72xf32, #tpu.memory_space<vmem>>, vector<1x72xf32>
    %15 = vector.broadcast %14 : vector<1x72xf32> to vector<34x72xf32>
    %16 = arith.addf %13, %15 : vector<34x72xf32>
    %cst_16 = arith.constant 0.000000e+00 : f32
    %17 = vector.broadcast %cst_16 : f32 to vector<34x72xf32>
    %18 = arith.maximumf %16, %17 : vector<34x72xf32>
    %19 = tpu.iota {dimensions = array<i32: 0>} : vector<34x72xi32>
    %c18_i32 = arith.constant 18 : i32
    %c0_i32 = arith.constant 0 : i32
    %20 = arith.cmpi eq, %c18_i32, %c0_i32 : i32
    %c1_i32 = arith.constant 1 : i32
    %21 = arith.select %20, %c1_i32, %c18_i32 : i32
    %22 = vector.broadcast %21 : i32 to vector<34x72xi32>
    %23 = arith.remsi %19, %22 : vector<34x72xi32>
    %c0_i32_17 = arith.constant 0 : i32
    %24 = vector.broadcast %c0_i32_17 : i32 to vector<34x72xi32>
    %25 = arith.cmpi ne, %23, %24 : vector<34x72xi32>
    %c0_i32_18 = arith.constant 0 : i32
    %26 = vector.broadcast %c0_i32_18 : i32 to vector<34x72xi32>
    %27 = arith.cmpi slt, %23, %26 : vector<34x72xi32>
    %c0_i32_19 = arith.constant 0 : i32
    %28 = arith.cmpi slt, %21, %c0_i32_19 : i32
    %29 = vector.broadcast %28 : i1 to vector<34x72xi1>
    %30 = vector.broadcast %29 : vector<34x72xi1> to vector<34x72xi1>
    %31 = arith.xori %27, %30 : vector<34x72xi1>
    %32 = arith.andi %31, %25 : vector<34x72xi1>
    %33 = vector.broadcast %21 : i32 to vector<34x72xi32>
    %34 = arith.addi %23, %33 : vector<34x72xi32>
    %35 = arith.select %32, %34, %23 : vector<34x72xi1>, vector<34x72xi32>
    %c16_i32 = arith.constant 16 : i32
    %36 = vector.broadcast %c16_i32 : i32 to vector<34x72xi32>
    %37 = arith.cmpi slt, %35, %36 : vector<34x72xi32>
    %cst_20 = arith.constant 0.000000e+00 : f32
    %38 = vector.broadcast %cst_20 : f32 to vector<34x72xf32>
    %39 = arith.select %37, %18, %38 : vector<34x72xi1>, vector<34x72xf32>
    %cst_21 = arith.constant 0.000000e+00 : bf16
    %40 = vector.broadcast %cst_21 : bf16 to vector<1x72xbf16>
    %c0_22 = arith.constant 0 : index
    %c0_23 = arith.constant 0 : index
    %41 = vector.load %arg8[%c0_22, %c0_23] : memref<36x72xbf16, #tpu.memory_space<vmem>>, vector<1x72xbf16>
    tpu.vector_store %arg8[%c0_22, %c0_23], %40 {strides = array<i32>} : memref<36x72xbf16, #tpu.memory_space<vmem>>, vector<1x72xbf16>,
    %cst_24 = arith.constant 0.000000e+00 : bf16
    %42 = vector.broadcast %cst_24 : bf16 to vector<1x72xbf16>
    %c35 = arith.constant 35 : index
    %c0_25 = arith.constant 0 : index
    %43 = vector.load %arg8[%c35, %c0_25] : memref<36x72xbf16, #tpu.memory_space<vmem>>, vector<1x72xbf16>
    tpu.vector_store %arg8[%c35, %c0_25], %42 {strides = array<i32>} : memref<36x72xbf16, #tpu.memory_space<vmem>>, vector<1x72xbf16>,
    %44 = arith.truncf %39 : vector<34x72xf32> to vector<34x72xbf16>
    %c1_26 = arith.constant 1 : index
    %c0_27 = arith.constant 0 : index
    %45 = vector.load %arg8[%c1_26, %c0_27] : memref<36x72xbf16, #tpu.memory_space<vmem>>, vector<34x72xbf16>
    tpu.vector_store %arg8[%c1_26, %c0_27], %44 {strides = array<i32>} : memref<36x72xbf16, #tpu.memory_space<vmem>>, vector<34x72xbf16>,
    %c0_28 = arith.constant 0 : index
    %c0_29 = arith.constant 0 : index
    %46 = vector.load %arg8[%c0_28, %c0_29] : memref<36x72xbf16, #tpu.memory_space<vmem>>, vector<34x72xbf16>
    %c0_30 = arith.constant 0 : index
    %c0_31 = arith.constant 0 : index
    %c0_32 = arith.constant 0 : index
    %47 = vector.load %arg4[%c0_30, %c0_31, %c0_32] : memref<3x72x128xbf16, #tpu.memory_space<vmem>>, vector<1x72x128xbf16>
    %48 = vector.shape_cast %47 : vector<1x72x128xbf16> to vector<72x128xbf16>
    %cst_33 = arith.constant dense<0.000000e+00> : vector<34x128xf32>
    %49 = tpu.matmul %46, %48, %cst_33 {dimension_numbers = #tpu.dot_dimension_numbers<[1], [0], [0], [1], [0, 0, 1, 1], [], []>} : vector<34x72xbf16>, vector<72x128xbf16>, vector<34x128xf32> -> vector<34x128xf32>
    %c1_34 = arith.constant 1 : index
    %c0_35 = arith.constant 0 : index
    %50 = vector.load %arg8[%c1_34, %c0_35] : memref<36x72xbf16, #tpu.memory_space<vmem>>, vector<34x72xbf16>
    %c1_36 = arith.constant 1 : index
    %c0_37 = arith.constant 0 : index
    %c0_38 = arith.constant 0 : index
    %51 = vector.load %arg4[%c1_36, %c0_37, %c0_38] : memref<3x72x128xbf16, #tpu.memory_space<vmem>>, vector<1x72x128xbf16>
    %52 = vector.shape_cast %51 : vector<1x72x128xbf16> to vector<72x128xbf16>
    %cst_39 = arith.constant dense<0.000000e+00> : vector<34x128xf32>
    %53 = tpu.matmul %50, %52, %cst_39 {dimension_numbers = #tpu.dot_dimension_numbers<[1], [0], [0], [1], [0, 0, 1, 1], [], []>} : vector<34x72xbf16>, vector<72x128xbf16>, vector<34x128xf32> -> vector<34x128xf32>
    %54 = arith.addf %49, %53 : vector<34x128xf32>
    %c2_40 = arith.constant 2 : index
    %c0_41 = arith.constant 0 : index
    %55 = vector.load %arg8[%c2_40, %c0_41] : memref<36x72xbf16, #tpu.memory_space<vmem>>, vector<34x72xbf16>
    %c2_42 = arith.constant 2 : index
    %c0_43 = arith.constant 0 : index
    %c0_44 = arith.constant 0 : index
    %56 = vector.load %arg4[%c2_42, %c0_43, %c0_44] : memref<3x72x128xbf16, #tpu.memory_space<vmem>>, vector<1x72x128xbf16>
    %57 = vector.shape_cast %56 : vector<1x72x128xbf16> to vector<72x128xbf16>
    %cst_45 = arith.constant dense<0.000000e+00> : vector<34x128xf32>
    %58 = tpu.matmul %55, %57, %cst_45 {dimension_numbers = #tpu.dot_dimension_numbers<[1], [0], [0], [1], [0, 0, 1, 1], [], []>} : vector<34x72xbf16>, vector<72x128xbf16>, vector<34x128xf32> -> vector<34x128xf32>
    %59 = arith.addf %54, %58 : vector<34x128xf32>
    %c1_46 = arith.constant 1 : index
    %c0_47 = arith.constant 0 : index
    %60 = vector.load %arg1[%c1_46, %c0_47] : memref<36x72xbf16, #tpu.memory_space<vmem>>, vector<34x72xbf16>
    %c0_48 = arith.constant 0 : index
    %c0_49 = arith.constant 0 : index
    %61 = vector.load %arg5[%c0_48, %c0_49] : memref<72x128xbf16, #tpu.memory_space<vmem>>, vector<72x128xbf16>
    %cst_50 = arith.constant dense<0.000000e+00> : vector<34x128xf32>
    %62 = tpu.matmul %60, %61, %cst_50 {dimension_numbers = #tpu.dot_dimension_numbers<[1], [0], [0], [1], [0, 0, 1, 1], [], []>} : vector<34x72xbf16>, vector<72x128xbf16>, vector<34x128xf32> -> vector<34x128xf32>
    %63 = arith.addf %59, %62 : vector<34x128xf32>
    %c0_51 = arith.constant 0 : index
    %c0_52 = arith.constant 0 : index
    %64 = vector.load %arg6[%c0_51, %c0_52] : memref<1x128xf32, #tpu.memory_space<vmem>>, vector<1x128xf32>
    %65 = vector.broadcast %64 : vector<1x128xf32> to vector<34x128xf32>
    %66 = arith.addf %63, %65 : vector<34x128xf32>
    %cst_53 = arith.constant 0.000000e+00 : f32
    %67 = vector.broadcast %cst_53 : f32 to vector<34x128xf32>
    %68 = arith.maximumf %66, %67 : vector<34x128xf32>
    %cst_54 = arith.constant 0.000000e+00 : f32
    %69 = vector.broadcast %cst_54 : f32 to vector<1x128xf32>
    %c0_55 = arith.constant 0 : index
    %c0_56 = arith.constant 0 : index
    %70 = vector.load %arg7[%c0_55, %c0_56] : memref<36x128xf32, #tpu.memory_space<vmem>>, vector<1x128xf32>
    tpu.vector_store %arg7[%c0_55, %c0_56], %69 {strides = array<i32>} : memref<36x128xf32, #tpu.memory_space<vmem>>, vector<1x128xf32>,
    %cst_57 = arith.constant 0.000000e+00 : f32
    %71 = vector.broadcast %cst_57 : f32 to vector<1x128xf32>
    %c35_58 = arith.constant 35 : index
    %c0_59 = arith.constant 0 : index
    %72 = vector.load %arg7[%c35_58, %c0_59] : memref<36x128xf32, #tpu.memory_space<vmem>>, vector<1x128xf32>
    tpu.vector_store %arg7[%c35_58, %c0_59], %71 {strides = array<i32>} : memref<36x128xf32, #tpu.memory_space<vmem>>, vector<1x128xf32>,
    %c1_60 = arith.constant 1 : index
    %c0_61 = arith.constant 0 : index
    %73 = vector.load %arg7[%c1_60, %c0_61] : memref<36x128xf32, #tpu.memory_space<vmem>>, vector<34x128xf32>
    tpu.vector_store %arg7[%c1_60, %c0_61], %68 {strides = array<i32>} : memref<36x128xf32, #tpu.memory_space<vmem>>, vector<34x128xf32>,
    return
  }
  func.func @transform_0(%arg0: i32) -> (i32, i32) {
    %c0_i32 = arith.constant 0 : i32
    %c0_i32_0 = arith.constant 0 : i32
    return %arg0, %c0_i32 : i32, i32
  }
  func.func @transform_1(%arg0: i32) -> (i32, i32, i32) {
    %c0_i32 = arith.constant 0 : i32
    %c0_i32_0 = arith.constant 0 : i32
    %c0_i32_1 = arith.constant 0 : i32
    %c0_i32_2 = arith.constant 0 : i32
    return %c0_i32, %c0_i32_0, %c0_i32_1 : i32, i32, i32
  }
  func.func @transform_2(%arg0: i32) -> (i32, i32) {
    %c0_i32 = arith.constant 0 : i32
    %c0_i32_0 = arith.constant 0 : i32
    %c0_i32_1 = arith.constant 0 : i32
    return %c0_i32, %c0_i32_0 : i32, i32
  }
  func.func @transform_3(%arg0: i32) -> (i32, i32, i32) {
    %c0_i32 = arith.constant 0 : i32
    %c0_i32_0 = arith.constant 0 : i32
    %c0_i32_1 = arith.constant 0 : i32
    %c0_i32_2 = arith.constant 0 : i32
    return %c0_i32, %c0_i32_0, %c0_i32_1 : i32, i32, i32
  }
  func.func @transform_4(%arg0: i32) -> (i32, i32) {
    %c0_i32 = arith.constant 0 : i32
    %c0_i32_0 = arith.constant 0 : i32
    %c0_i32_1 = arith.constant 0 : i32
    return %c0_i32, %c0_i32_0 : i32, i32
  }
  func.func @transform_5(%arg0: i32) -> (i32, i32) {
    %c0_i32 = arith.constant 0 : i32
    %c0_i32_0 = arith.constant 0 : i32
    %c0_i32_1 = arith.constant 0 : i32
    return %c0_i32, %c0_i32_0 : i32, i32
  }
  func.func @transform_6(%arg0: i32) -> (i32, i32) {
    %c0_i32 = arith.constant 0 : i32
    %c0_i32_0 = arith.constant 0 : i32
    return %arg0, %c0_i32 : i32, i32
  }
}

</mosaic_0001>

<bundles_post_ra>
// kernel: block_pallas.1
= control target key start
LH: loop header
LB: loop body
LE: loop exit
PB: predicated region body
PF: predicated region fallthrough
CT: control target
= control target key end

     0   :  { %v1552_v0 = vmov 0.0   ;;  %vm1553_vm0 = vmmov 0   ;;  %vm123_vm1 = vcmask 1043456   ;;  %vm62_vm2 = vsmask.f32 7424  ;;  %s2008_s1 = inlined_call_operand.vmem [shape: bf16[3,72,72], index: 1, kind: input, shape index: {}]   ;;  %s2009_s0 = inlined_call_operand.vmem [shape: bf16[36,72], index: 0, kind: input, shape index: {}]   ;;  %s2010_s3 = inlined_call_operand.vmem [shape: bf16[3,72,128], index: 3, kind: input, shape index: {}]   ;;  %s2011_s4 = inlined_call_operand.vmem [shape: bf16[72,128], index: 4, kind: input, shape index: {}]   ;;  %s2012_s2 = inlined_call_operand.vmem [shape: f32[1,72], index: 2, kind: input, shape index: {}]   ;;  %s2013_s6 = inlined_call_operand.vmem [shape: f32[36,128], index: 6, kind: output, shape index: {}]   ;;  %s2014_s5 = inlined_call_operand.vmem [shape: f32[1,128], index: 5, kind: input, shape index: {}]  }
   0x1   :  { %1328 = vmatprep.subr.bf16.mxu0 %v1552_v0  ;;  %1350 = vmatprep.subr.bf16.mxu1 %v1552_v0  ;;  %v1504_v1 = vld [vmem:[%s2008_s1 + $0x24] sm:$0xff]   ;;  %v1506_v3 = vld [vmem:[%s2008_s1 + $0x2c] sm:$0xff]   ;;  %v1508_v5 = vld [vmem:[%s2008_s1 + $0x34] sm:$0xff]   ;;  %vm113_vm3 = vcmask 588800   ;;  %vm293_vm4 = vcmask 1046528   ;;  %vm512_vm5 = vcmask 581632   ;;  %v416_v62 = vlaneseq }
   0x2   :  { %v1505_v2 = vld [vmem:[%s2008_s1] sm:$0xff]   ;;  %1338 = vmatprep.mubr.msk.bf16.mxu0 %vm1553_vm0, %v1552_v0  ;;  %1360 = vmatprep.mubr.msk.bf16.mxu1 %vm1553_vm0, %v1552_v0  ;;  %v1507_v4 = vld [vmem:[%s2008_s1 + $0x8] sm:$0xff]   ;;  %v1509_v6 = vld [vmem:[%s2008_s1 + $0x10] sm:$0xff]   ;;  %vm513_vm6 = vsmask.f32 256  ;;  %vm518_vm8 = vcmask 582657  }
   0x3   :  { %1329 = vmatpush3.bf16.msra.mxu0 %v1504_v1  ;;  %1351 = vmatpush3.bf16.msra.mxu1 %v1505_v2  ;;  %v1510_v7 = vld [vmem:[%s2008_s1 + $0x3c] sm:$0xff]   ;;  %v1512_v9 = vld [vmem:[%s2008_s1 + $0x44] ss:$0 sps:$4 sm:$0xff]   ;;  %v1638_v13 = vld [vmem:[%s2009_s0 + $0x8] sm:$0xff]   ;;  %vm519_vm9 = vsmask.f32 7942 }
   0x4   :  { %1330 = vmatprep.subr.bf16.mxu0 %v1552_v0  ;;  %1352 = vmatprep.subr.bf16.mxu1 %v1552_v0  ;;  %v1511_v8 = vld [vmem:[%s2008_s1 + $0x18] sm:$0xff]   ;;  %v24_v10 = vld [vmem:[%s2009_s0] sm:$0xf]  ;;  %v1632_v11 = vld [vmem:[%s2009_s0 + $0x4] sm:$0xf]  ;;  %v71_v17 = vshll.u32 %v1638_v13, 16 }
   0x5   :  { %v1164_v12 = vcombine.low %v24_v10, %v1632_v11  ;;  %v1513_v14 = vld [vmem:[%s2008_s1 + $0x20] ss:$0 sps:$4 sm:$0xff]   ;;  %v125_v18 = vsel %vm123_vm1, %v1512_v9, 0  ;;  %v1518_v21 = vld [vmem:[%s2009_s0 + $0x10] ss:$0 sps:$4 sm:$0x33]   ;;  %vm514_vm7 = vmand %vm512_vm5, %vm513_vm6 }
   0x6   :  { %v73_v20 = vrot.slane %v71_v17, 1  ;;  %v221_v22 = vsel %vm123_vm1, %v1513_v14, 0  ;;  %v1516_v25 = vld [vmem:[%s2008_s1 + $0x48] sm:$0xff]   ;;  %v75_v26 = vshrl.u32 %v1638_v13, 16  ;;  %v79_v27 = vshll.u32 %v1518_v21, 16  ;;  %v1517_v28 = vld [vmem:[%s2008_s1 + $0x50] sm:$0xff]   ;;  %vm520_vm10 = vmand %vm518_vm8, %vm519_vm9 }
   0x7   :  { %1331 = vmatpush3.bf16.msra.mxu0 %v1506_v3  ;;  %1353 = vmatpush3.bf16.msra.mxu1 %v1507_v4  ;;  %v64_v15 = vshrl.u32 %v1164_v12, 16  ;;  %v66_v16 = vshll.u32 %v1164_v12, 16  ;;  %v1519_v32 = vld [vmem:[%s2008_s1 + $0x58] sm:$0xff]   ;;  %v83_v33 = vshrl.u32 %v1518_v21, 16  ;;  %v1520_v34 = vld [vmem:[%s2008_s1 + $0x60] sm:$0xff]   ;;  %v295_v42 = vrot.slane %v1638_v13, 1 }
   0x8   :  { %1332 = vmatprep.subr.bf16.mxu0 %v1552_v0  ;;  %1354 = vmatprep.subr.bf16.mxu1 %v1552_v0  ;;  %v77_v29 = vor.u32 %v75_v26, %v73_v20  ;;  %v81_v30 = vrot.slane %v79_v27, 1  ;;  %v1522_v35 = vld [vmem:[%s2008_s1 + $0x68] ss:$0 sps:$4 sm:$0xff]   ;;  %v279_v36 = vld [vmem:[%s2009_s0] sm:$0xe]  ;;  %v297_v44 = vrot.slane %v1518_v21, 1 }
   0x9   :  { %v68_v19 = vrot.slane %v66_v16, 1  ;;  %v1521_v38 = vld [vmem:[%s2009_s0 + $0x10] ss:$0 sps:$4 sm:$0x11]   ;;  %v1193_v39 = vcombine.low %v279_v36, %v1632_v11  ;;  %v336_v40 = vsel %vm123_vm1, %v1522_v35, 0  ;;  %v1524_v48 = vld [vmem:[%s2010_s3] sm:$0xff]  }
   0xa   :  { %v82_v31 = vsel %vm62_vm2, %v77_v29, %v81_v30  ;;  %v85_v37 = vor.u32 %v83_v33, %v81_v30  ;;  %v298_v45 = vsel %vm293_vm4, %v295_v42, %v297_v44  ;;  %v515_v46 = vld [vmem:[#allocation2] sm:$0x1]  ;;  %v1525_v49 = vld [vmem:[%s2010_s3 + $0x8] sm:$0xff]   ;;  %v1526_v50 = vld [vmem:[%s2010_s3 + $0x10] sm:$0xff]   ;;  %v417_v63 = vshrl.u32 %v416_v62, 7  ;;  %1144 = vst [vmem:[%s2013_s6] sm:$0x1] %v1552_v0 }
   0xb   :  { %1333 = vmatpush3.bf16.msra.mxu0 %v1508_v5  ;;  %1355 = vmatpush3.bf16.msra.mxu1 %v1509_v6  ;;  %v69_v23 = vor.u32 %v68_v19, %v64_v15  ;;  %v294_v41 = vrot.slane %v1193_v39, 1  ;;  %v516_v47 = vsel %vm514_vm7, 0, %v515_v46  ;;  %v1527_v51 = vld [vmem:[%s2010_s3 + $0x24] sm:$0xff]   ;;  %v1528_v52 = vld [vmem:[%s2010_s3 + $0x18] sm:$0xff]   ;;  %v521_v53 = vld [vmem:[#allocation2 + $0x10] sm:$0x2] }
   0xc   :  { %1334 = vmatprep.subr.bf16.mxu0 %v1552_v0  ;;  %1356 = vmatprep.subr.bf16.mxu1 %v1552_v0  ;;  %517 = vst [vmem:[#allocation2] sm:$0x1] %v516_v47  ;;  %v1530_v54 = vld [vmem:[%s2010_s3 + $0x20] ss:$0 sps:$4 sm:$0xff]   ;;  %v522_v55 = vsel %vm520_vm10, 0, %v521_v53  ;;  %v1529_v56 = vld [vmem:[%s2010_s3 + $0x2c] sm:$0xff]  }
   0xd   :  { %v74_v24 = vsel %vm62_vm2, %v69_v23, %v73_v20  ;;  %v296_v43 = vsel %vm293_vm4, %v294_v41, %v295_v42  ;;  %523 = vst [vmem:[#allocation2 + $0x10] sm:$0x2] %v522_v55  ;;  %v800_v57 = vsel %vm123_vm1, %v1530_v54, 0  ;;  %v1531_v58 = vld [vmem:[%s2010_s3 + $0x34] sm:$0xff]   ;;  %v1533_v59 = vld [vmem:[%s2010_s3 + $0x3c] sm:$0xff]   ;;  %v418_v1 = vadd.s32 8, %v417_v63 }
   0xe   :  { %v1535_v60 = vld [vmem:[%s2010_s3 + $0x44] ss:$0 sps:$4 sm:$0xff]   ;;  %v1760_v2 = vmul.u32.u64.low 3817748708, %v417_v63  ;;  %v1761_v3 = vmul.u32.u64.high 3817748708, %v417_v63, %v1760_v2  ;;  %v419_v9 = vadd.s32 16, %v417_v63  ;;  %v420_v17 = vadd.s32 24, %v417_v63 }
   0xf   :  { %1335 = vmatpush3.bf16.msra.mxu0 %v1510_v7  ;;  %1357 = vmatpush3.bf16.msra.mxu1 %v1511_v8  ;;  %v704_v61 = vsel %vm123_vm1, %v1535_v60, 0  ;;  %v1763_v5 = vmul.u32.u64.low 3817748708, %v418_v1  ;;  %v1764_v6 = vmul.u32.u64.high 3817748708, %v418_v1, %v1763_v5  ;;  %v421_v33 = vadd.s32 32, %v417_v63  ;;  %1145 = vst [vmem:[%s2013_s6 + $0x23] sm:$0x1] %v1552_v0 }
  0x10   :  { %1336 = vmatprep.subr.bf16.mxu0 %v1552_v0  ;;  %1358 = vmatprep.subr.bf16.mxu1 %v1552_v0  ;;  %v428_v20 = vshrl.u32 %v1761_v3, 4 }
  0x13   :  { %1337 = vmatpush3.bf16.msra.mxu0 %v125_v18  ;;  %1359 = vmatpush3.bf16.msra.mxu1 %v221_v22  ;;  %v1766_v18 = vmul.u32.u64.low 3817748708, %v419_v9  ;;  %v1767_v19 = vmul.u32.u64.high 3817748708, %v419_v9, %v1766_v18  ;;  %v439_v22 = vshrl.u32 %v1764_v6, 4 }
  0x14   :  { %1372 = vmatprep.subr.bf16.mxu0 %v1552_v0  ;;  %1394 = vmatprep.subr.bf16.mxu1 %v1552_v0 }
  0x15   :  { %v440_v36 = vmul.u32 18, %v439_v22 }
  0x16   :  { %1339 = vmatmul.mubr.msk.bf16.vlgmr.msra.gmra.mrb[0].mxu0 %vm113_vm3, %v74_v24  ;;  %1361 = vmatmul.mubr.msk.bf16.vlgmr.msra.gmra.mrb[0].mxu1 %vm113_vm3, %v1164_v12  ;;  %v1771_v23 = vmul.u32.u64.low 3817748708, %v420_v17  ;;  %v1772_v24 = vmul.u32.u64.high 3817748708, %v420_v17, %v1771_v23 }
  0x17   :  { %1373 = vmatpush3.bf16.msra.mxu0 %v1516_v25  ;;  %1342 = vmatprep.mubr.msk.bf16.mxu0 %vm1553_vm0, %v1552_v0  ;;  %v441_v42 = vsub.s32 %v418_v1, %v440_v36 }
  0x18   :  { %1374 = vmatprep.subr.bf16.mxu0 %v1552_v0  ;;  %1364 = vmatprep.mubr.msk.bf16.mxu1 %vm1553_vm0, %v1552_v0 }
  0x19   :  { %1395 = vmatpush3.bf16.msra.mxu1 %v1527_v51  ;;  %vm478_vm13 = vcmp.ne.s32.totalorder %v441_v42, 0  ;;  %vm483_vm14 = vcmp.lt.s32.totalorder %v441_v42, 0 }
  0x1a   :  { %1396 = vmatprep.subr.bf16.mxu1 %v1552_v0  ;;  %vm1789_vm5 = vmand %vm483_vm14, %vm478_vm13 }
  0x1b   :  { %1375 = vmatpush3.bf16.msra.mxu0 %v1517_v28 }
  0x1c   :  { %1376 = vmatprep.subr.bf16.mxu0 %v1552_v0 }
  0x1d   :  { %1397 = vmatpush3.bf16.msra.mxu1 %v1529_v56 }
  0x1e   :  { %1343 = vmatmul.mubr.msk.bf16.gmra.mrb[4].mxu0 %vm113_vm3, %v82_v31  ;;  %1365 = vmatmul.mubr.msk.bf16.gmra.mrb[4].mxu1 %vm113_vm3, %v1638_v13 }
  0x1f   :  { %1377 = vmatpush3.bf16.msra.mxu0 %v1519_v32  ;;  %1346 = vmatprep.mubr.msk.bf16.mxu0 %vm1553_vm0, %v1552_v0  ;;  %v429_v32 = vmul.u32 18, %v428_v20 }
  0x20   :  { %1378 = vmatprep.subr.bf16.mxu0 %v1552_v0  ;;  %1368 = vmatprep.mubr.msk.bf16.mxu1 %vm1553_vm0, %v1552_v0 }
  0x21   :  { %1398 = vmatprep.subr.bf16.mxu1 %v1552_v0 }
  0x22   :  { %1399 = vmatpush3.bf16.msra.mxu1 %v1531_v58 }
  0x23   :  { %1379 = vmatpush3.bf16.msra.mxu0 %v1520_v34  ;;  %1400 = vmatprep.subr.bf16.mxu1 %v1552_v0 }
  0x24   :  { %1380 = vmatprep.subr.bf16.mxu0 %v1552_v0 }
  0x26   :  { %1347 = vmatmul.mubr.msk.bf16.gmra.mrb[8].mxu0 %vm113_vm3, %v85_v37  ;;  %1369 = vmatmul.mubr.msk.bf16.gmra.mrb[8].mxu1 %vm113_vm3, %v1521_v38  ;;  %v450_v37 = vshrl.u32 %v1767_v19, 4  ;;  %v430_v38 = vsub.s32 %v417_v63, %v429_v32 }
  0x27   :  { %1381 = vmatpush3.bf16.msra.mxu0 %v336_v40  ;;  %1382 = vmatprep.mubr.msk.bf16.mxu0 %vm1553_vm0, %v1552_v0  ;;  %v1779_v39 = vmul.u32.u64.low 3817748708, %v421_v33  ;;  %v1780_v40 = vmul.u32.u64.high 3817748708, %v421_v33, %v1779_v39 }
  0x28   :  { %1416 = vmatprep.subr.bf16.mxu0 %v1552_v0  ;;  %1404 = vmatprep.mubr.msk.bf16.mxu1 %vm1553_vm0, %v1552_v0  ;;  %v451_v46 = vmul.u32 18, %v450_v37  ;;  %vm477_vm11 = vcmp.ne.s32.totalorder %v430_v38, 0  ;;  %vm482_vm12 = vcmp.lt.s32.totalorder %v430_v38, 0  ;;  %v492_v54 = vadd.s32 18, %v430_v38  ;;  %v593_v37 = vld [vmem:[#allocation2] sm:$0xf] }
  0x29   :  { %1401 = vmatpush3.bf16.msra.mxu1 %v1533_v59  ;;  %vm1785_vm15 = vmand %vm482_vm12, %vm477_vm11  ;;  %v472_v59 = vshrl.u32 %v1780_v40, 4 }
  0x2a   :  { %1402 = vmatprep.subr.bf16.mxu1 %v1552_v0  ;;  %v452_v55 = vsub.s32 %v419_v9, %v451_v46  ;;  %v497_v1 = vsel %vm1785_vm15, %v492_v54, %v430_v38  ;;  %vm590_vm15 = vcmask 584704  }
  0x2b   :  { %v473_v9 = vmul.u32 18, %v472_v59  ;;  %vm502_vm9 = vcmp.lt.s32.totalorder %v497_v1, 16 }
  0x2c   :  { %vm479_vm7 = vcmp.ne.s32.totalorder %v452_v55, 0  ;;  %vm484_vm8 = vcmp.lt.s32.totalorder %v452_v55, 0 }
  0x2d   :  { %1403 = vmatpush3.bf16.msra.mxu1 %v704_v61  ;;  %v1797_v61 = vld [vmem:[%s2012_s2] ss:$0 sm:$0xff]  ;;  %vm1804_vm10 = vmand %vm484_vm8, %vm479_vm7  ;;  %v474_v18 = vsub.s32 %v421_v33, %v473_v9 }
  0x2e   :  { %1383 = vmatmul.mubr.msk.bf16.vlgmr.msra.gmra.mrb[12].mxu0 %vm113_vm3, %v296_v43  ;;  %1438 = vmatprep.subr.bf16.mxu1 %v1552_v0  ;;  %v461_v43 = vshrl.u32 %v1772_v24, 4 }
  0x2f   :  { %1386 = vmatprep.mubr.msk.bf16.mxu0 %vm1553_vm0, %v1552_v0  ;;  %1417 = vmatpush3.bf16.msra.mxu0 %v1524_v48  ;;  %vm481_vm8 = vcmp.ne.s32.totalorder %v474_v18, 0  ;;  %v496_v40 = vadd.s32 18, %v474_v18 }
  0x30   :  { %1418 = vmatprep.subr.bf16.mxu0 %v1552_v0 }
  0x33   :  { %1419 = vmatpush3.bf16.msra.mxu0 %v1525_v49 }
  0x34   :  { %1420 = vmatprep.subr.bf16.mxu0 %v1552_v0 }
  0x36   :  { %1387 = vmatmul.mubr.msk.bf16.gmra.mrb[16].mxu0 %vm113_vm3, %v298_v45 }
  0x37   :  { %1390 = vmatprep.mubr.msk.bf16.mxu0 %vm1553_vm0, %v1552_v0  ;;  %1421 = vmatpush3.bf16.msra.mxu0 %v1526_v50 }
  0x38   :  { %1422 = vmatprep.subr.bf16.mxu0 %v1552_v0 }
  0x3b   :  { %1423 = vmatpush3.bf16.msra.mxu0 %v1528_v52  ;;  %v462_v52 = vmul.u32 18, %v461_v43 }
  0x3c   :  { %1424 = vmatprep.subr.bf16.mxu0 %v1552_v0 }
  0x3d   :  { %v463_v62 = vsub.s32 %v420_v17, %v462_v52 }
  0x3e   :  { %1391 = vmatmul.mubr.msk.bf16.gmra.mrb[20].mxu0 %vm113_vm3, %v297_v44 }
  0x3f   :  { %1426 = vmatprep.mubr.msk.bf16.mxu0 %vm1553_vm0, %v1552_v0  ;;  %1425 = vmatpush3.bf16.msra.mxu0 %v800_v57  ;;  %v493_v57 = vadd.s32 18, %v441_v42  ;;  %vm480_vm11 = vcmp.ne.s32.totalorder %v463_v62, 0  ;;  %vm485_vm12 = vcmp.lt.s32.totalorder %v463_v62, 0 }
  0x40   :  { %1460 = vmatprep.subr.bf16.mxu0 %v1552_v0  ;;  %vm1811_vm14 = vmand %vm485_vm12, %vm480_vm11 }
  0xe9   :  { %v161_v4 = vpop.f32.mrb[0].mxu0  ;;  %v257_v7 = vpop.f32.mrb[0].mxu1 }
  0xea   :  { %v1340_v8 = vpop.f32.mrb[1].mxu0  ;;  %v258_v10 = vadd.f32 %v257_v7, %v161_v4  ;;  %v1362_v11 = vpop.f32.mrb[1].mxu1  ;;  %v498_v4 = vsel %vm1789_vm5, %v493_v57, %v441_v42  ;;  %vm591_vm5 = vsmask.f32 7938 }
  0xeb   :  { %v164_v12 = vpop.f32.mrb[2].mxu0  ;;  %v260_v13 = vpop.f32.mrb[2].mxu1  ;;  %v494_v8 = vadd.s32 18, %v452_v55  ;;  %vm503_vm13 = vcmp.lt.s32.totalorder %v498_v4, 16  ;;  %vm1826_vm11 = vmand %vm590_vm15, %vm591_vm5  ;;  %vm600_vm5 = vcmask 582656  }
  0xec   :  { %v1341_v14 = vpop.f32.mrb[3].mxu0  ;;  %v261_v15 = vadd.f32 %v260_v13, %v164_v12  ;;  %v1363_v16 = vpop.f32.mrb[3].mxu1  ;;  %v495_v13 = vadd.s32 18, %v463_v62 }
  0xf1   :  { %v169_v21 = vpop.f32.mrb[4].mxu0  ;;  %v265_v25 = vpop.f32.mrb[4].mxu1 }
  0xf2   :  { %v1344_v26 = vpop.f32.mrb[5].mxu0  ;;  %v1774_v27 = vadd.f32 %v265_v25, %v169_v21  ;;  %v1366_v28 = vpop.f32.mrb[5].mxu1 }
  0xf3   :  { %v172_v29 = vpop.f32.mrb[6].mxu0  ;;  %v268_v30 = vpop.f32.mrb[6].mxu1 }
  0xf4   :  { %v1345_v31 = vpop.f32.mrb[7].mxu0  ;;  %v1776_v34 = vadd.f32 %v268_v30, %v172_v29  ;;  %v1367_v35 = vpop.f32.mrb[7].mxu1  ;;  %v500_v29 = vsel %vm1811_vm14, %v495_v13, %v463_v62 }
  0xf5   :  { %vm505_vm12 = vcmp.lt.s32.totalorder %v500_v29, 16 }
  0xf9   :  { %v177_v41 = vpop.f32.mrb[8].mxu0  ;;  %v273_v45 = vpop.f32.mrb[8].mxu1 }
  0xfa   :  { %v1348_v44 = vpop.f32.mrb[9].mxu0  ;;  %v1783_v47 = vadd.f32 %v273_v45, %v177_v41  ;;  %v1370_v49 = vpop.f32.mrb[9].mxu1 }
  0xfb   :  { %v180_v48 = vpop.f32.mrb[10].mxu0  ;;  %v276_v51 = vpop.f32.mrb[10].mxu1 }
  0xfc   :  { %v1349_v50 = vpop.f32.mrb[11].mxu0  ;;  %v1371_v53 = vpop.f32.mrb[11].mxu1 }
 0x101   :  { %v372_v60 = vpop.f32.mrb[12].mxu0 }
 0x102   :  { %v394_v63 = vadd.f32 %v372_v60, %v258_v10  ;;  %v1384_v2 = vpop.f32.mrb[13].mxu0 }
 0x103   :  { %v375_v3 = vpop.f32.mrb[14].mxu0 }
 0x104   :  { %v406_v5 = vadd.f32 %v1797_v61, %v394_v63  ;;  %v395_v6 = vadd.f32 %v375_v3, %v261_v15  ;;  %v1385_v7 = vpop.f32.mrb[15].mxu0  ;;  %v499_v15 = vsel %vm1804_vm10, %v494_v8, %v452_v55  ;;  %vm540_vm10 = vsmask.f32 4368 }
 0x105   :  { %vm1816_vm7 = vcmp.lt.s32.totalorder %v499_v15, 16  ;;  %vm1837_vm14 = vmor %vm513_vm6, %vm540_vm10  ;;  %v1862_v15 = vld [vmem:[%s2011_s4] sm:$0xff]  }
 0x106   :  { %v411_v10 = vmax.f32 %v406_v5, 0.0  ;;  %v407_v12 = vadd.f32 %v1797_v61, %v395_v6 }
 0x108   :  { %v507_v14 = vsel %vm502_vm9, %v411_v10, 0.0  ;;  %v412_v16 = vmax.f32 %v407_v12, 0.0  ;;  %vm486_vm9 = vcmp.lt.s32.totalorder %v474_v18, 0 }
 0x109   :  { %v1267_v19 = vpack.c.bf16 %v507_v14, %v507_v14  ;;  %v380_v20 = vpop.f32.mrb[16].mxu0 }
 0x10a   :  { %v508_v21 = vsel %vm503_vm13, %v412_v16, 0.0  ;;  %v396_v22 = vadd.f32 %v380_v20, %v1774_v27  ;;  %v1388_v23 = vpop.f32.mrb[17].mxu0  ;;  %vm1832_vm13 = vmand %vm486_vm9, %vm481_vm8 }
 0x10b   :  { %v543_v24 = vshrl.u32 %v1267_v19, 16  ;;  %v1268_v25 = vpack.c.bf16 %v508_v21, %v508_v21  ;;  %v383_v28 = vpop.f32.mrb[18].mxu0  ;;  %v546_v27 = vshll.u32 %v1267_v19, 16  ;;  %v501_v55 = vsel %vm1832_vm13, %v496_v40, %v474_v18 }
 0x10c   :  { %v408_v30 = vadd.f32 %v1797_v61, %v396_v22  ;;  %v397_v31 = vadd.f32 %v383_v28, %v1776_v34  ;;  %v1389_v32 = vpop.f32.mrb[19].mxu0  ;;  %vm506_vm6 = vcmp.lt.s32.totalorder %v501_v55, 16  ;;  %v603_v22 = vld [vmem:[#allocation2 + $0x10] sm:$0x3]  ;;  %v1549_v28 = vld [vmem:[%s2009_s0] sm:$0xff]  }
 0x10d   :  { %v545_v33 = vrot.slane %v543_v24, 7  ;;  %v551_v35 = vshrl.u32 %v1268_v25, 16  ;;  %v554_v42 = vshll.u32 %v1268_v25, 16  ;;  %v1873_v24 = vld [vmem:[%s2011_s4 + $0x8] sm:$0xff]  }
 0x10e   :  { %v413_v38 = vmax.f32 %v408_v30, 0.0  ;;  %v409_v39 = vadd.f32 %v1797_v61, %v397_v31  ;;  %v1887_v31 = vld [vmem:[%s2011_s4 + $0x10] sm:$0xff]  }
 0x10f   :  { %v548_v41 = vor.u32 %v546_v27, %v545_v33  ;;  %v553_v34 = vrot.slane %v551_v35, 7  ;;  %v549_v48 = vrot.slane %v545_v33, 4  ;;  %v1007_v27 = vshll.u32 %v1549_v28, 16 }
 0x110   :  { %v509_v45 = vsel %vm1816_vm7, %v413_v38, 0.0  ;;  %v414_v46 = vmax.f32 %v409_v39, 0.0  ;;  %vm601_vm7 = vsmask.f32 1280  ;;  %v1902_v38 = vld [vmem:[%s2009_s0 + $0x8] sm:$0xff]   ;;  %v1908_v39 = vld [vmem:[%s2011_s4 + $0x18] sm:$0xff]  }
 0x111   :  { %v594_v49 = vsel %vm1826_vm11, %v548_v41, %v593_v37  ;;  %v556_v50 = vor.u32 %v554_v42, %v553_v34  ;;  %v1269_v51 = vpack.c.bf16 %v509_v45, %v509_v45  ;;  %v388_v52 = vpop.f32.mrb[20].mxu0  ;;  %v558_v4 = vrot.slane %v553_v34, 4  ;;  %vm602_vm8 = vmand %vm600_vm5, %vm601_vm7  ;;  %v1536_v37 = vld [vmem:[%s2010_s3 + $0x48] sm:$0xff]   ;;  %v1547_v41 = vld [vmem:[%s2011_s4 + $0x20] ss:$0 sps:$4 sm:$0xff]  }
 0x112   :  { %595 = vst [vmem:[#allocation2] sm:$0xf] %v594_v49  ;;  %v510_v53 = vsel %vm505_vm12, %v414_v46, 0.0  ;;  %v398_v54 = vadd.f32 %v388_v52, %v1783_v47  ;;  %v1392_v56 = vpop.f32.mrb[21].mxu0  ;;  %v1538_v34 = vld [vmem:[%s2010_s3 + $0x50] sm:$0xff]   ;;  %v1005_v42 = vshrl.u32 %v1549_v28, 16 }
 0x113   :  { %v557_v57 = vsel %vm1837_vm14, %v549_v48, %v556_v50  ;;  %v560_v58 = vshrl.u32 %v1269_v51, 16  ;;  %v1270_v59 = vpack.c.bf16 %v510_v53, %v510_v53  ;;  %v391_v60 = vpop.f32.mrb[22].mxu0  ;;  %v563_v2 = vshll.u32 %v1269_v51, 16  ;;  %v1541_v53 = vld [vmem:[%s2010_s3 + $0x58] sm:$0xff]  }
 0x114   :  { %597 = vst.msk [vmem:[#allocation2 + $0x4] sm:$0xf] %vm590_vm15, %v557_v57  ;;  %v410_v62 = vadd.f32 %v1797_v61, %v398_v54  ;;  %v1393_v63 = vpop.f32.mrb[23].mxu0  ;;  %v1009_v43 = vrot.slane %v1007_v27, 1  ;;  %v1012_v45 = vshll.u32 %v1902_v38, 16  ;;  %v1064_v50 = vsel %vm123_vm1, %v1547_v41, 0 }
 0x115   :  { %v562_v1 = vrot.slane %v560_v58, 7  ;;  %v569_v3 = vshrl.u32 %v1270_v59, 16  ;;  %v572_v7 = vshll.u32 %v1270_v59, 16  ;;  %v1544_v57 = vld [vmem:[%s2010_s3 + $0x60] sm:$0xff]   ;;  %v1546_v59 = vld [vmem:[%s2010_s3 + $0x68] ss:$0 sps:$4 sm:$0xff]  }
 0x116   :  { %v415_v47 = vmax.f32 %v410_v62, 0.0  ;;  %v1010_v54 = vor.u32 %v1009_v43, %v1005_v42  ;;  %v1014_v55 = vrot.slane %v1012_v45, 1  ;;  %v914_v63 = vsel %vm123_vm1, %v1546_v59, 0 }
 0x117   :  { %v565_v5 = vor.u32 %v563_v2, %v562_v1  ;;  %v571_v6 = vrot.slane %v569_v3, 7  ;;  %v567_v11 = vrot.slane %v562_v1, 4 }
 0x118   :  { %v511_v8 = vsel %vm506_vm6, %v415_v47, 0.0  ;;  %v1015_v58 = vsel %vm62_vm2, %v1010_v54, %v1014_v55 }
 0x119   :  { %v566_v9 = vsel %vm1837_vm14, %v558_v4, %v565_v5  ;;  %v574_v10 = vor.u32 %v572_v7, %v571_v6  ;;  %v1271_v12 = vpack.c.bf16 %v511_v8, %v511_v8  ;;  %v606_v14 = vld [vmem:[#allocation2] sm:$0xf]  ;;  %v576_v20 = vrot.slane %v571_v6, 4  ;;  %v1551_v7 = vld [vmem:[%s2009_s0 + $0x10] ss:$0 sps:$4 sm:$0x33]  }
 0x11a   :  { %598 = vst.msk [vmem:[#allocation2 + $0x8] sm:$0xf] %vm590_vm15, %v566_v9  ;;  %v858_v1 = vld [vmem:[#allocation2] sm:$0xe]  ;;  %v1016_v8 = vshrl.u32 %v1902_v38, 16  ;;  %v1020_v9 = vshll.u32 %v1551_v7, 16 }
 0x11b   :  { %v575_v61 = vsel %vm1837_vm14, %v567_v11, %v574_v10  ;;  %v578_v13 = vshrl.u32 %v1271_v12, 16  ;;  %v1857_v16 = vld [vmem:[#allocation2 + $0x4] sm:$0xf]  ;;  %v581_v19 = vshll.u32 %v1271_v12, 16 }
 0x11c   :  { %599 = vst.msk [vmem:[#allocation2 + $0xc] sm:$0xf] %vm590_vm15, %v575_v61  ;;  %v1217_v17 = vcombine.low %v606_v14, %v1857_v16  ;;  %v1246_v2 = vcombine.low %v858_v1, %v1857_v16  ;;  %v1018_v11 = vor.u32 %v1016_v8, %v1014_v55  ;;  %v1022_v10 = vrot.slane %v1020_v9, 1 }
 0x11d   :  { %v580_v18 = vrot.slane %v578_v13, 7  ;;  %v1024_v61 = vshrl.u32 %v1551_v7, 16 }
 0x11e   :  { %1427 = vmatmul.mubr.msk.bf16.vlgmr.msra.gmra.mrb[24].mxu0 %vm113_vm3, %v1217_v17  ;;  %v647_v23 = vshll.u32 %v1217_v17, 16  ;;  %v645_v32 = vshrl.u32 %v1217_v17, 16  ;;  %v872_v47 = vrot.slane %v1246_v2, 1  ;;  %v1023_v12 = vsel %vm62_vm2, %v1018_v11, %v1022_v10 }
 0x11f   :  { %v583_v21 = vor.u32 %v581_v19, %v580_v18  ;;  %1430 = vmatprep.mubr.msk.bf16.mxu0 %vm1553_vm0, %v1552_v0  ;;  %1461 = vmatpush3.bf16.msra.mxu0 %v1862_v15  ;;  %v1026_v13 = vor.u32 %v1024_v61, %v1022_v10 }
 0x120   :  { %1462 = vmatprep.subr.bf16.mxu0 %v1552_v0  ;;  %v649_v30 = vrot.slane %v647_v23, 1 }
 0x121   :  { %v584_v25 = vsel %vm1837_vm14, %v576_v20, %v583_v21 }
 0x122   :  { %v604_v26 = vsel %vm602_vm8, %v584_v25, %v603_v22  ;;  %v650_v35 = vor.u32 %v649_v30, %v645_v32 }
 0x123   :  { %605 = vst [vmem:[#allocation2 + $0x10] sm:$0x3] %v604_v26  ;;  %v1881_v29 = vld [vmem:[#allocation2 + $0x8] sm:$0xff]   ;;  %1463 = vmatpush3.bf16.msra.mxu0 %v1873_v24 }
 0x124   :  { %1464 = vmatprep.subr.bf16.mxu0 %v1552_v0  ;;  %v652_v33 = vshll.u32 %v1881_v29, 16  ;;  %v656_v48 = vshrl.u32 %v1881_v29, 16  ;;  %v873_v3 = vrot.slane %v1881_v29, 1 }
 0x126   :  { %1431 = vmatmul.mubr.msk.bf16.gmra.mrb[28].mxu0 %vm113_vm3, %v1881_v29  ;;  %v654_v36 = vrot.slane %v652_v33, 1  ;;  %v874_v4 = vsel %vm293_vm4, %v872_v47, %v873_v3 }
 0x127   :  { %1434 = vmatprep.mubr.msk.bf16.mxu0 %vm1553_vm0, %v1552_v0  ;;  %1465 = vmatpush3.bf16.msra.mxu0 %v1887_v31 }
 0x128   :  { %1466 = vmatprep.subr.bf16.mxu0 %v1552_v0  ;;  %v655_v40 = vsel %vm62_vm2, %v650_v35, %v654_v36  ;;  %v658_v51 = vor.u32 %v656_v48, %v654_v36 }
 0x129   :  { %1405 = vmatmul.mubr.msk.bf16.vlgmr.msra.gmra.mrb[12].mxu1 %vm113_vm3, %v655_v40 }
 0x12a   :  { %1439 = vmatpush3.bf16.msra.mxu1 %v1536_v37  ;;  %1408 = vmatprep.mubr.msk.bf16.mxu1 %vm1553_vm0, %v1552_v0  ;;  %v1540_v44 = vld [vmem:[#allocation2 + $0x10] ss:$0 sps:$4 sm:$0x33]  }
 0x12b   :  { %v1537_v46 = vld [vmem:[#allocation2 + $0x10] ss:$0 sps:$4 sm:$0x11]   ;;  %1440 = vmatprep.subr.bf16.mxu1 %v1552_v0  ;;  %1467 = vmatpush3.bf16.msra.mxu0 %v1908_v39  ;;  %v660_v49 = vshll.u32 %v1540_v44, 16  ;;  %v664_v60 = vshrl.u32 %v1540_v44, 16  ;;  %v875_v5 = vrot.slane %v1540_v44, 1 }
 0x12c   :  { %1468 = vmatprep.subr.bf16.mxu0 %v1552_v0 }
 0x12d   :  { %v662_v52 = vrot.slane %v660_v49, 1  ;;  %v876_v6 = vsel %vm293_vm4, %v873_v3, %v875_v5 }
 0x12e   :  { %1435 = vmatmul.mubr.msk.bf16.gmra.mrb[32].mxu0 %vm113_vm3, %v1537_v46  ;;  %1441 = vmatpush3.bf16.msra.mxu1 %v1538_v34 }
 0x12f   :  { %1470 = vmatprep.mubr.msk.bf16.mxu0 %vm1553_vm0, %v1552_v0  ;;  %1442 = vmatprep.subr.bf16.mxu1 %v1552_v0  ;;  %v663_v56 = vsel %vm62_vm2, %v658_v51, %v662_v52  ;;  %v666_v62 = vor.u32 %v664_v60, %v662_v52  ;;  %v1266_v51 = vld [vmem:[%s2014_s5] ss:$0 sm:$0xff] }
 0x130   :  { %1469 = vmatpush3.bf16.msra.mxu0 %v1064_v50 }
 0x131   :  { %1409 = vmatmul.mubr.msk.bf16.gmra.mrb[16].mxu1 %vm113_vm3, %v663_v56 }
 0x132   :  { %1443 = vmatpush3.bf16.msra.mxu1 %v1541_v53  ;;  %1412 = vmatprep.mubr.msk.bf16.mxu1 %vm1553_vm0, %v1552_v0 }
 0x133   :  { %1444 = vmatprep.subr.bf16.mxu1 %v1552_v0 }
 0x136   :  { %1471 = vmatmul.mubr.msk.bf16.vlgmr.msra.gmra.mrb[36].mxu0 %vm113_vm3, %v1015_v58  ;;  %1445 = vmatpush3.bf16.msra.mxu1 %v1544_v57 }
 0x137   :  { %1446 = vmatprep.subr.bf16.mxu1 %v1552_v0 }
 0x139   :  { %1413 = vmatmul.mubr.msk.bf16.gmra.mrb[20].mxu1 %vm113_vm3, %v666_v62 }
 0x13a   :  { %1447 = vmatpush3.bf16.msra.mxu1 %v914_v63  ;;  %1448 = vmatprep.mubr.msk.bf16.mxu1 %vm1553_vm0, %v1552_v0 }
 0x13b   :  { %1482 = vmatprep.subr.bf16.mxu1 %v1552_v0 }
 0x141   :  { %1449 = vmatmul.mubr.msk.bf16.vlgmr.msra.gmra.mrb[24].mxu1 %vm113_vm3, %v874_v4 }
 0x142   :  { %1487 = vmatpush3.bf16.msra.mxu1 %v1862_v15  ;;  %1452 = vmatprep.mubr.msk.bf16.mxu1 %vm1553_vm0, %v1552_v0 }
 0x143   :  { %1483 = vmatprep.subr.bf16.mxu1 %v1552_v0 }
 0x146   :  { %1488 = vmatpush3.bf16.msra.mxu1 %v1873_v24 }
 0x147   :  { %1484 = vmatprep.subr.bf16.mxu1 %v1552_v0 }
 0x149   :  { %1453 = vmatmul.mubr.msk.bf16.gmra.mrb[28].mxu1 %vm113_vm3, %v876_v6 }
 0x14a   :  { %1489 = vmatpush3.bf16.msra.mxu1 %v1887_v31  ;;  %1456 = vmatprep.mubr.msk.bf16.mxu1 %vm1553_vm0, %v1552_v0 }
 0x14b   :  { %1485 = vmatprep.subr.bf16.mxu1 %v1552_v0 }
 0x14e   :  { %1490 = vmatpush3.bf16.msra.mxu1 %v1908_v39 }
 0x14f   :  { %1486 = vmatprep.subr.bf16.mxu1 %v1552_v0 }
 0x151   :  { %1457 = vmatmul.mubr.msk.bf16.gmra.mrb[32].mxu1 %vm113_vm3, %v875_v5 }
 0x152   :  { %1491 = vmatpush3.bf16.msra.mxu1 %v1064_v50  ;;  %1474 = vmatprep.mubr.msk.bf16.mxu1 %vm1553_vm0, %v1552_v0 }
 0x159   :  { %1475 = vmatmul.mubr.msk.bf16.vlgmr.msra.gmra.mrb[36].mxu1 %vm113_vm3, %v1023_v12 }
 0x15a   :  { %1478 = vmatprep.mubr.msk.bf16.mxu1 %vm1553_vm0, %v1552_v0 }
 0x161   :  { %1479 = vmatmul.mubr.msk.bf16.gmra.mrb[40].mxu1 %vm113_vm3, %v1026_v13 }
 0x1f1   :  { %v836_v14 = vpop.f32.mrb[24].mxu0 }
 0x1f2   :  { %v1428_v16 = vpop.f32.mrb[25].mxu0 }
 0x1f3   :  { %v839_v15 = vpop.f32.mrb[26].mxu0 }
 0x1f4   :  { %v1429_v17 = vpop.f32.mrb[27].mxu0 }
 0x1f9   :  { %v844_v18 = vpop.f32.mrb[28].mxu0 }
 0x1fa   :  { %v1432_v19 = vpop.f32.mrb[29].mxu0 }
 0x1fb   :  { %v847_v20 = vpop.f32.mrb[30].mxu0 }
 0x1fc   :  { %v1433_v21 = vpop.f32.mrb[31].mxu0  ;;  %v740_v22 = vpop.f32.mrb[12].mxu1 }
 0x1fd   :  { %v837_v23 = vadd.f32 %v836_v14, %v740_v22  ;;  %v1406_v24 = vpop.f32.mrb[13].mxu1 }
 0x1fe   :  { %v743_v25 = vpop.f32.mrb[14].mxu1 }
 0x1ff   :  { %v840_v26 = vadd.f32 %v839_v15, %v743_v25  ;;  %v1407_v28 = vpop.f32.mrb[15].mxu1 }
 0x201   :  { %v852_v29 = vpop.f32.mrb[32].mxu0 }
 0x202   :  { %v1436_v30 = vpop.f32.mrb[33].mxu0 }
 0x203   :  { %v855_v31 = vpop.f32.mrb[34].mxu0 }
 0x204   :  { %v1437_v32 = vpop.f32.mrb[35].mxu0  ;;  %v748_v33 = vpop.f32.mrb[16].mxu1 }
 0x205   :  { %v845_v0 = vadd.f32 %v844_v18, %v748_v33  ;;  %v1410_v27 = vpop.f32.mrb[17].mxu1 }
 0x206   :  { %v751_v35 = vpop.f32.mrb[18].mxu1 }
 0x207   :  { %v848_v36 = vadd.f32 %v847_v20, %v751_v35  ;;  %v1411_v37 = vpop.f32.mrb[19].mxu1 }
 0x209   :  { %v1100_v38 = vpop.f32.mrb[36].mxu0 }
 0x20a   :  { %v1472_v39 = vpop.f32.mrb[37].mxu0 }
 0x20b   :  { %v1103_v40 = vpop.f32.mrb[38].mxu0 }
 0x20c   :  { %v1473_v41 = vpop.f32.mrb[39].mxu0  ;;  %v756_v34 = vpop.f32.mrb[20].mxu1 }
 0x20d   :  { %v853_v42 = vadd.f32 %v852_v29, %v756_v34  ;;  %v1414_v43 = vpop.f32.mrb[21].mxu1 }
 0x20e   :  { %v759_v44 = vpop.f32.mrb[22].mxu1 }
 0x20f   :  { %v1415_v45 = vpop.f32.mrb[23].mxu1 }
 0x214   :  { %v950_v46 = vpop.f32.mrb[24].mxu1 }
 0x215   :  { %v972_v48 = vadd.f32 %v950_v46, %v837_v23  ;;  %v1450_v49 = vpop.f32.mrb[25].mxu1 }
 0x216   :  { %v953_v50 = vpop.f32.mrb[26].mxu1 }
 0x217   :  { %v973_v52 = vadd.f32 %v953_v50, %v840_v26  ;;  %v1122_v53 = vadd.f32 %v1100_v38, %v972_v48  ;;  %v1451_v54 = vpop.f32.mrb[27].mxu1 }
 0x219   :  { %v1134_v55 = vadd.f32 %v1266_v51, %v1122_v53  ;;  %v1123_v56 = vadd.f32 %v1103_v40, %v973_v52 }
 0x21b   :  { %v1139_v57 = vmax.f32 %v1134_v55, 0.0  ;;  %v1135_v58 = vadd.f32 %v1266_v51, %v1123_v56 }
 0x21c   :  { %v958_v59 = vpop.f32.mrb[28].mxu1 }
 0x21d   :  { %1146 = vst [vmem:[%s2013_s6 + $0x1] sm:$0xff] %v1139_v57  ;;  %v1140_v60 = vmax.f32 %v1135_v58, 0.0  ;;  %v974_v62 = vadd.f32 %v958_v59, %v845_v0  ;;  %v1454_v63 = vpop.f32.mrb[29].mxu1 }
 0x21e   :  { %v961_v1 = vpop.f32.mrb[30].mxu1 }
 0x21f   :  { %1147 = vst [vmem:[%s2013_s6 + $0x9] sm:$0xff] %v1140_v60  ;;  %v975_v2 = vadd.f32 %v961_v1, %v848_v36  ;;  %v1455_v3 = vpop.f32.mrb[31].mxu1 }
 0x224   :  { %v966_v47 = vpop.f32.mrb[32].mxu1 }
 0x225   :  { %v976_v4 = vadd.f32 %v966_v47, %v853_v42  ;;  %v1458_v5 = vpop.f32.mrb[33].mxu1 }
 0x226   :  { %v969_v6 = vpop.f32.mrb[34].mxu1 }
 0x227   :  { %v1459_v7 = vpop.f32.mrb[35].mxu1 }
 0x22c   :  { %v1108_v8 = vpop.f32.mrb[36].mxu1 }
 0x22d   :  { %v1124_v9 = vadd.f32 %v1108_v8, %v974_v62  ;;  %v1476_v11 = vpop.f32.mrb[37].mxu1 }
 0x22e   :  { %v1111_v10 = vpop.f32.mrb[38].mxu1 }
 0x22f   :  { %v1136_v12 = vadd.f32 %v1266_v51, %v1124_v9  ;;  %v1125_v61 = vadd.f32 %v1111_v10, %v975_v2  ;;  %v1477_v13 = vpop.f32.mrb[39].mxu1 }
 0x231   :  { %v1141_v14 = vmax.f32 %v1136_v12, 0.0  ;;  %v1137_v16 = vadd.f32 %v1266_v51, %v1125_v61 }
 0x233   :  { %1148 = vst [vmem:[%s2013_s6 + $0x11] sm:$0xff] %v1141_v14  ;;  %v1142_v15 = vmax.f32 %v1137_v16, 0.0 }
 0x234   :  { %v1116_v17 = vpop.f32.mrb[40].mxu1 }
 0x235   :  { %1149 = vst [vmem:[%s2013_s6 + $0x19] sm:$0xff] %v1142_v15  ;;  %v1126_v18 = vadd.f32 %v1116_v17, %v976_v4  ;;  %v1480_v19 = vpop.f32.mrb[41].mxu1 }
 0x236   :  { %v1119_v20 = vpop.f32.mrb[42].mxu1 }
 0x237   :  { %v1138_v21 = vadd.f32 %v1266_v51, %v1126_v18  ;;  %v1481_v22 = vpop.f32.mrb[43].mxu1 }
 0x239   :  { %v1143_v23 = vmax.f32 %v1138_v21, 0.0 }
 0x23b   :  { %1150 = vst [vmem:[%s2013_s6 + $0x21] sm:$0x3] %v1143_v23 }

</bundles_post_ra>
